<compile_context>
chip_gen: v7x
topology: tpu7x:2x2x1
jax: 0.10.0
libtpu: 0.0.40
codegen_flags: <defaults>
</compile_context>

<pallas_src>
import functools

import jax
import jax.numpy as jnp
from jax.experimental import pallas as pl
from jax.experimental.pallas import tpu as pltpu


def _gru_cell_kernel(x_ref, h_ref, wi_ref, wh_ref, brz_ref, bn_ref, o_ref):
    # x_ref, h_ref : (TB, F)   f32
    # wi_ref, wh_ref: (3, F, F) per-gate W^T (gate order r, z, n), f32 or bf16
    # brz_ref      : (2, 1, F)  f32  pre-folded biases for r, z gates
    # bn_ref       : (2, 1, F)  f32  [b_in, b_hn] for the n gate
    # o_ref        : (TB, F)   f32
    w_dtype = wi_ref.dtype
    h_f32 = h_ref[...].astype(jnp.float32)
    x_c = x_ref[...].astype(w_dtype)          # feed the MXU in the weight dtype
    h_c = h_ref[...].astype(w_dtype)

    def _mm(v, w_ref, g):
        # (TB, F) @ (F, F) on the MXU, f32 accumulate.
        return jnp.dot(v, w_ref[g], preferred_element_type=jnp.float32)

    # r / z gates: input and hidden contributions sum directly, biases folded.
    r = jax.nn.sigmoid(_mm(x_c, wi_ref, 0) + _mm(h_c, wh_ref, 0) + brz_ref[0])
    z = jax.nn.sigmoid(_mm(x_c, wi_ref, 1) + _mm(h_c, wh_ref, 1) + brz_ref[1])

    # n gate: hidden-side bias must stay inside the r * (...) term.
    i_n = _mm(x_c, wi_ref, 2) + bn_ref[0]
    h_n = _mm(h_c, wh_ref, 2) + bn_ref[1]
    n = jnp.tanh(i_n + r * h_n)

    h_new = (1.0 - z) * n + z * h_f32
    o_ref[...] = h_new.astype(o_ref.dtype)


def prepare_gru_params(w_ih, w_hh, b_ih, b_hh, feature,
                       param_dtype=jnp.bfloat16):
    """One-time conversion of PyTorch nn.GRU params into kernel layout.

    w_ih, w_hh: (3F, F) PyTorch layout ([W_r; W_z; W_n]); b_ih, b_hh: (3F,).
    Returns:
      wi_t, wh_t: (3, F, F) per-gate transposed weights in `param_dtype`
      b_rz      : (2, 1, F) f32 pre-folded r/z biases (b_i + b_h)
      b_n       : (2, 1, F) f32 [b_in, b_hn]
    Do this once (outside any scan / step loop) so each GRU step pays zero
    transpose / cast / bias-fold HBM traffic.
    """
    f = feature
    wi = jnp.asarray(w_ih, jnp.float32).reshape(3, f, f)     # (gate, out, in)
    wh = jnp.asarray(w_hh, jnp.float32).reshape(3, f, f)
    wi_t = jnp.transpose(wi, (0, 2, 1)).astype(param_dtype)  # (gate, in, out)
    wh_t = jnp.transpose(wh, (0, 2, 1)).astype(param_dtype)
    bi = jnp.asarray(b_ih, jnp.float32).reshape(3, 1, f)
    bh = jnp.asarray(b_hh, jnp.float32).reshape(3, 1, f)
    b_rz = bi[0:2] + bh[0:2]                                  # (2, 1, F)
    b_n = jnp.concatenate([bi[2:3], bh[2:3]], axis=0)         # (2, 1, F)
    return wi_t, wh_t, b_rz, b_n


@functools.partial(jax.jit, static_argnames=("block_b", "donate_hidden"))
def gru_agg_forward(hidden_value, new_value, params, *, block_b=256,
                    donate_hidden=False):
    """Pallas equivalent of GRUAgg.forward.

    hidden_value, new_value: (B, F) float32
    params: output of prepare_gru_params()
    Returns (x, h), each (B, F) float32; for a 1-step GRU, x is h.
    """
    wi_t, wh_t, b_rz, b_n = params
    b, f = new_value.shape
    tb = min(b, block_b)                     # 256 fills the v6e/v7x MXU rows
    grid = (pl.cdiv(b, tb),)

    w_bytes = 2 * 3 * f * f * jnp.dtype(wi_t.dtype).itemsize
    cost = pl.CostEstimate(
        flops=12 * b * f * f,                # two (B,F)x(F,3F) matmuls
        transcendentals=3 * b * f,           # 2 sigmoid + 1 tanh per element
        bytes_accessed=3 * b * f * 4 + w_bytes + 4 * f * 4,
    )

    h_out = pl.pallas_call(
        _gru_cell_kernel,
        out_shape=jax.ShapeDtypeStruct((b, f), jnp.float32),
        grid=grid,
        in_specs=[
            pl.BlockSpec((tb, f), lambda i: (i, 0)),        # new_value (x)
            pl.BlockSpec((tb, f), lambda i: (i, 0)),        # hidden_value (h)
            pl.BlockSpec((3, f, f), lambda i: (0, 0, 0)),   # W_ih^T (resident)
            pl.BlockSpec((3, f, f), lambda i: (0, 0, 0)),   # W_hh^T (resident)
            pl.BlockSpec((2, 1, f), lambda i: (0, 0, 0)),   # folded r/z biases
            pl.BlockSpec((2, 1, f), lambda i: (0, 0, 0)),   # [b_in, b_hn]
        ],
        out_specs=pl.BlockSpec((tb, f), lambda i: (i, 0)),
        compiler_params=pltpu.CompilerParams(
            dimension_semantics=("parallel",),              # v7x: 2 TCs
            vmem_limit_bytes=64 * 1024 * 1024,
        ),
        cost_estimate=cost,
        # Donate hidden state (in-place-style update) when the caller steps
        # the GRU inside a scan; off by default so hidden_value stays usable.
        input_output_aliases={1: 0} if donate_hidden else {},
    )(new_value, hidden_value, wi_t, wh_t, b_rz, b_n)

    # Single-step GRU: output sequence element == new hidden state.
    return h_out, h_out


def _gru_agg_reference(hidden_value, new_value, w_ih, w_hh, b_ih, b_hh):
    """Pure-JAX reference matching torch.nn.GRU (1 layer, 1 step)."""
    f = new_value.shape[1]
    gi = new_value @ w_ih.T + b_ih
    gh = hidden_value @ w_hh.T + b_hh
    i_r, i_z, i_n = gi[:, :f], gi[:, f:2 * f], gi[:, 2 * f:]
    h_r, h_z, h_n = gh[:, :f], gh[:, f:2 * f], gh[:, 2 * f:]
    r = jax.nn.sigmoid(i_r + h_r)
    z = jax.nn.sigmoid(i_z + h_z)
    n = jnp.tanh(i_n + r * h_n)
    h_new = (1.0 - z) * n + z * hidden_value
    return h_new, h_new


if __name__ == "__main__":
    # Small deterministic shapes consistent with GRUAgg(feature=32).
    batch, feature = 8, 32

    key = jax.random.PRNGKey(0)
    k_h, k_x, k_wi, k_wh, k_bi, k_bh = jax.random.split(key, 6)

    bound = 1.0 / (feature ** 0.5)           # PyTorch default init range
    w_ih = jax.random.uniform(k_wi, (3 * feature, feature), jnp.float32,
                              -bound, bound)
    w_hh = jax.random.uniform(k_wh, (3 * feature, feature), jnp.float32,
                              -bound, bound)
    b_ih = jax.random.uniform(k_bi, (3 * feature,), jnp.float32, -bound, bound)
    b_hh = jax.random.uniform(k_bh, (3 * feature,), jnp.float32, -bound, bound)

    hidden_value = jax.random.normal(k_h, (batch, feature), jnp.float32)
    new_value = jax.random.normal(k_x, (batch, feature), jnp.float32)

    x_ref, h_ref = _gru_agg_reference(hidden_value, new_value,
                                      w_ih, w_hh, b_ih, b_hh)

    # f32 weights: tight check against the reference.
    params_f32 = prepare_gru_params(w_ih, w_hh, b_ih, b_hh, feature,
                                    param_dtype=jnp.float32)
    x32, h32 = gru_agg_forward(hidden_value, new_value, params_f32)
    jax.block_until_ready((x32, h32))
    assert x32.shape == (batch, feature) and h32.shape == (batch, feature)
    assert jnp.allclose(x32, x_ref, atol=1e-5, rtol=1e-5)
    assert jnp.allclose(h32, h_ref, atol=1e-5, rtol=1e-5)

    # bf16 weights (bandwidth-bound fast path): loose tolerance vs f32 ref.
    params_bf16 = prepare_gru_params(w_ih, w_hh, b_ih, b_hh, feature,
                                     param_dtype=jnp.bfloat16)
    xbf, hbf = gru_agg_forward(hidden_value, new_value, params_bf16)
    jax.block_until_ready((xbf, hbf))
    assert jnp.allclose(xbf, x_ref, atol=2e-2, rtol=2e-2)
    assert jnp.allclose(hbf, h_ref, atol=2e-2, rtol=2e-2)

    print("KERNEL_OK")
</pallas_src>

<mosaic_0001>
module attributes {stable_mosaic.version = 11 : i64} {
  func.func @_gru_cell_kernel(%arg0: i32, %arg1: memref<8x32xf32, #tpu.memory_space<vmem>>, %arg2: memref<8x32xf32, #tpu.memory_space<vmem>>, %arg3: memref<3x32x32xf32, #tpu.memory_space<vmem>>, %arg4: memref<3x32x32xf32, #tpu.memory_space<vmem>>, %arg5: memref<2x1x32xf32, #tpu.memory_space<vmem>>, %arg6: memref<2x1x32xf32, #tpu.memory_space<vmem>>, %arg7: memref<8x32xf32, #tpu.memory_space<vmem>>) attributes {dimension_semantics = [#tpu.dimension_semantics<parallel>], iteration_bounds = array<i64: 1>, scalar_prefetch = 0 : i64, scratch_operands = 0 : i64, tpu.core_type = #tpu.core_type<tc>, window_params = [{transform_indices = @transform_0, window_bounds = array<i64: 8, 32>}, {transform_indices = @transform_1, window_bounds = array<i64: 8, 32>}, {pipeline_mode = #tpu.pipeline_mode<synchronous>, transform_indices = @transform_2, window_bounds = array<i64: 3, 32, 32>}, {pipeline_mode = #tpu.pipeline_mode<synchronous>, transform_indices = @transform_3, window_bounds = array<i64: 3, 32, 32>}, {pipeline_mode = #tpu.pipeline_mode<synchronous>, transform_indices = @transform_4, window_bounds = array<i64: 2, 1, 32>}, {pipeline_mode = #tpu.pipeline_mode<synchronous>, transform_indices = @transform_5, window_bounds = array<i64: 2, 1, 32>}, {transform_indices = @transform_6, window_bounds = array<i64: 8, 32>}]} {
    %c0 = arith.constant 0 : index
    %c0_0 = arith.constant 0 : index
    %0 = vector.load %arg2[%c0, %c0_0] : memref<8x32xf32, #tpu.memory_space<vmem>>, vector<8x32xf32>
    %c0_1 = arith.constant 0 : index
    %c0_2 = arith.constant 0 : index
    %1 = vector.load %arg1[%c0_1, %c0_2] : memref<8x32xf32, #tpu.memory_space<vmem>>, vector<8x32xf32>
    %c0_3 = arith.constant 0 : index
    %c0_4 = arith.constant 0 : index
    %2 = vector.load %arg2[%c0_3, %c0_4] : memref<8x32xf32, #tpu.memory_space<vmem>>, vector<8x32xf32>
    %c0_5 = arith.constant 0 : index
    %c0_6 = arith.constant 0 : index
    %c0_7 = arith.constant 0 : index
    %3 = vector.load %arg3[%c0_5, %c0_6, %c0_7] : memref<3x32x32xf32, #tpu.memory_space<vmem>>, vector<1x32x32xf32>
    %4 = vector.shape_cast %3 : vector<1x32x32xf32> to vector<32x32xf32>
    %cst = arith.constant dense<0.000000e+00> : vector<8x32xf32>
    %5 = tpu.matmul %1, %4, %cst {dimension_numbers = #tpu.dot_dimension_numbers<[1], [0], [0], [1], [0, 0, 1, 1], [], []>} : vector<8x32xf32>, vector<32x32xf32>, vector<8x32xf32> -> vector<8x32xf32>
    %c0_8 = arith.constant 0 : index
    %c0_9 = arith.constant 0 : index
    %c0_10 = arith.constant 0 : index
    %6 = vector.load %arg4[%c0_8, %c0_9, %c0_10] : memref<3x32x32xf32, #tpu.memory_space<vmem>>, vector<1x32x32xf32>
    %7 = vector.shape_cast %6 : vector<1x32x32xf32> to vector<32x32xf32>
    %cst_11 = arith.constant dense<0.000000e+00> : vector<8x32xf32>
    %8 = tpu.matmul %2, %7, %cst_11 {dimension_numbers = #tpu.dot_dimension_numbers<[1], [0], [0], [1], [0, 0, 1, 1], [], []>} : vector<8x32xf32>, vector<32x32xf32>, vector<8x32xf32> -> vector<8x32xf32>
    %9 = arith.addf %5, %8 : vector<8x32xf32>
    %c0_12 = arith.constant 0 : index
    %c0_13 = arith.constant 0 : index
    %c0_14 = arith.constant 0 : index
    %10 = vector.load %arg5[%c0_12, %c0_13, %c0_14] : memref<2x1x32xf32, #tpu.memory_space<vmem>>, vector<1x1x32xf32>
    %11 = vector.shape_cast %10 : vector<1x1x32xf32> to vector<1x32xf32>
    %12 = vector.broadcast %11 : vector<1x32xf32> to vector<8x32xf32>
    %13 = arith.addf %9, %12 : vector<8x32xf32>
    %14 = arith.negf %13 : vector<8x32xf32>
    %15 = math.exp %14 : vector<8x32xf32>
    %cst_15 = arith.constant 1.000000e+00 : f32
    %16 = vector.broadcast %cst_15 : f32 to vector<8x32xf32>
    %17 = arith.addf %16, %15 : vector<8x32xf32>
    %18 = arith.divf %16, %17 : vector<8x32xf32>
    %c1 = arith.constant 1 : index
    %c0_16 = arith.constant 0 : index
    %c0_17 = arith.constant 0 : index
    %19 = vector.load %arg3[%c1, %c0_16, %c0_17] : memref<3x32x32xf32, #tpu.memory_space<vmem>>, vector<1x32x32xf32>
    %20 = vector.shape_cast %19 : vector<1x32x32xf32> to vector<32x32xf32>
    %cst_18 = arith.constant dense<0.000000e+00> : vector<8x32xf32>
    %21 = tpu.matmul %1, %20, %cst_18 {dimension_numbers = #tpu.dot_dimension_numbers<[1], [0], [0], [1], [0, 0, 1, 1], [], []>} : vector<8x32xf32>, vector<32x32xf32>, vector<8x32xf32> -> vector<8x32xf32>
    %c1_19 = arith.constant 1 : index
    %c0_20 = arith.constant 0 : index
    %c0_21 = arith.constant 0 : index
    %22 = vector.load %arg4[%c1_19, %c0_20, %c0_21] : memref<3x32x32xf32, #tpu.memory_space<vmem>>, vector<1x32x32xf32>
    %23 = vector.shape_cast %22 : vector<1x32x32xf32> to vector<32x32xf32>
    %cst_22 = arith.constant dense<0.000000e+00> : vector<8x32xf32>
    %24 = tpu.matmul %2, %23, %cst_22 {dimension_numbers = #tpu.dot_dimension_numbers<[1], [0], [0], [1], [0, 0, 1, 1], [], []>} : vector<8x32xf32>, vector<32x32xf32>, vector<8x32xf32> -> vector<8x32xf32>
    %25 = arith.addf %21, %24 : vector<8x32xf32>
    %c1_23 = arith.constant 1 : index
    %c0_24 = arith.constant 0 : index
    %c0_25 = arith.constant 0 : index
    %26 = vector.load %arg5[%c1_23, %c0_24, %c0_25] : memref<2x1x32xf32, #tpu.memory_space<vmem>>, vector<1x1x32xf32>
    %27 = vector.shape_cast %26 : vector<1x1x32xf32> to vector<1x32xf32>
    %28 = vector.broadcast %27 : vector<1x32xf32> to vector<8x32xf32>
    %29 = arith.addf %25, %28 : vector<8x32xf32>
    %30 = arith.negf %29 : vector<8x32xf32>
    %31 = math.exp %30 : vector<8x32xf32>
    %cst_26 = arith.constant 1.000000e+00 : f32
    %32 = vector.broadcast %cst_26 : f32 to vector<8x32xf32>
    %33 = arith.addf %32, %31 : vector<8x32xf32>
    %34 = arith.divf %32, %33 : vector<8x32xf32>
    %c2 = arith.constant 2 : index
    %c0_27 = arith.constant 0 : index
    %c0_28 = arith.constant 0 : index
    %35 = vector.load %arg3[%c2, %c0_27, %c0_28] : memref<3x32x32xf32, #tpu.memory_space<vmem>>, vector<1x32x32xf32>
    %36 = vector.shape_cast %35 : vector<1x32x32xf32> to vector<32x32xf32>
    %cst_29 = arith.constant dense<0.000000e+00> : vector<8x32xf32>
    %37 = tpu.matmul %1, %36, %cst_29 {dimension_numbers = #tpu.dot_dimension_numbers<[1], [0], [0], [1], [0, 0, 1, 1], [], []>} : vector<8x32xf32>, vector<32x32xf32>, vector<8x32xf32> -> vector<8x32xf32>
    %c0_30 = arith.constant 0 : index
    %c0_31 = arith.constant 0 : index
    %c0_32 = arith.constant 0 : index
    %38 = vector.load %arg6[%c0_30, %c0_31, %c0_32] : memref<2x1x32xf32, #tpu.memory_space<vmem>>, vector<1x1x32xf32>
    %39 = vector.shape_cast %38 : vector<1x1x32xf32> to vector<1x32xf32>
    %40 = vector.broadcast %39 : vector<1x32xf32> to vector<8x32xf32>
    %41 = arith.addf %37, %40 : vector<8x32xf32>
    %c2_33 = arith.constant 2 : index
    %c0_34 = arith.constant 0 : index
    %c0_35 = arith.constant 0 : index
    %42 = vector.load %arg4[%c2_33, %c0_34, %c0_35] : memref<3x32x32xf32, #tpu.memory_space<vmem>>, vector<1x32x32xf32>
    %43 = vector.shape_cast %42 : vector<1x32x32xf32> to vector<32x32xf32>
    %cst_36 = arith.constant dense<0.000000e+00> : vector<8x32xf32>
    %44 = tpu.matmul %2, %43, %cst_36 {dimension_numbers = #tpu.dot_dimension_numbers<[1], [0], [0], [1], [0, 0, 1, 1], [], []>} : vector<8x32xf32>, vector<32x32xf32>, vector<8x32xf32> -> vector<8x32xf32>
    %c1_37 = arith.constant 1 : index
    %c0_38 = arith.constant 0 : index
    %c0_39 = arith.constant 0 : index
    %45 = vector.load %arg6[%c1_37, %c0_38, %c0_39] : memref<2x1x32xf32, #tpu.memory_space<vmem>>, vector<1x1x32xf32>
    %46 = vector.shape_cast %45 : vector<1x1x32xf32> to vector<1x32xf32>
    %47 = vector.broadcast %46 : vector<1x32xf32> to vector<8x32xf32>
    %48 = arith.addf %44, %47 : vector<8x32xf32>
    %49 = arith.mulf %18, %48 : vector<8x32xf32>
    %50 = arith.addf %41, %49 : vector<8x32xf32>
    %51 = math.tanh %50 : vector<8x32xf32>
    %cst_40 = arith.constant 1.000000e+00 : f32
    %52 = vector.broadcast %cst_40 : f32 to vector<8x32xf32>
    %53 = arith.subf %52, %34 : vector<8x32xf32>
    %54 = arith.mulf %53, %51 : vector<8x32xf32>
    %55 = arith.mulf %34, %0 : vector<8x32xf32>
    %56 = arith.addf %54, %55 : vector<8x32xf32>
    %c0_41 = arith.constant 0 : index
    %c0_42 = arith.constant 0 : index
    %57 = vector.load %arg7[%c0_41, %c0_42] : memref<8x32xf32, #tpu.memory_space<vmem>>, vector<8x32xf32>
    tpu.vector_store %arg7[%c0_41, %c0_42], %56 {strides = array<i32>} : memref<8x32xf32, #tpu.memory_space<vmem>>, vector<8x32xf32>,
    return
  }
  func.func @transform_0(%arg0: i32) -> (i32, i32) {
    %c0_i32 = arith.constant 0 : i32
    %c0_i32_0 = arith.constant 0 : i32
    return %arg0, %c0_i32 : i32, i32
  }
  func.func @transform_1(%arg0: i32) -> (i32, i32) {
    %c0_i32 = arith.constant 0 : i32
    %c0_i32_0 = arith.constant 0 : i32
    return %arg0, %c0_i32 : i32, i32
  }
  func.func @transform_2(%arg0: i32) -> (i32, i32, i32) {
    %c0_i32 = arith.constant 0 : i32
    %c0_i32_0 = arith.constant 0 : i32
    %c0_i32_1 = arith.constant 0 : i32
    %c0_i32_2 = arith.constant 0 : i32
    return %c0_i32, %c0_i32_0, %c0_i32_1 : i32, i32, i32
  }
  func.func @transform_3(%arg0: i32) -> (i32, i32, i32) {
    %c0_i32 = arith.constant 0 : i32
    %c0_i32_0 = arith.constant 0 : i32
    %c0_i32_1 = arith.constant 0 : i32
    %c0_i32_2 = arith.constant 0 : i32
    return %c0_i32, %c0_i32_0, %c0_i32_1 : i32, i32, i32
  }
  func.func @transform_4(%arg0: i32) -> (i32, i32, i32) {
    %c0_i32 = arith.constant 0 : i32
    %c0_i32_0 = arith.constant 0 : i32
    %c0_i32_1 = arith.constant 0 : i32
    %c0_i32_2 = arith.constant 0 : i32
    return %c0_i32, %c0_i32_0, %c0_i32_1 : i32, i32, i32
  }
  func.func @transform_5(%arg0: i32) -> (i32, i32, i32) {
    %c0_i32 = arith.constant 0 : i32
    %c0_i32_0 = arith.constant 0 : i32
    %c0_i32_1 = arith.constant 0 : i32
    %c0_i32_2 = arith.constant 0 : i32
    return %c0_i32, %c0_i32_0, %c0_i32_1 : i32, i32, i32
  }
  func.func @transform_6(%arg0: i32) -> (i32, i32) {
    %c0_i32 = arith.constant 0 : i32
    %c0_i32_0 = arith.constant 0 : i32
    return %arg0, %c0_i32 : i32, i32
  }
}

</mosaic_0001>

<bundles_post_ra>
// kernel: gru_agg_forward.1
= control target key start
LH: loop header
LB: loop body
LE: loop exit
PB: predicated region body
PF: predicated region fallthrough
CT: control target
= control target key end

     0   :  { %11 = vsyncpa [#allocation3], 0  ;;  %s1137_s0 = inlined_call_operand.hbm [shape: f32[8,32], index: 0, kind: input, shape index: {}]   ;;  %s1138_s1 = inlined_call_operand.hbm [shape: f32[8,32], index: 1, kind: input, shape index: {}]   ;;  %s1139_s2 = inlined_call_operand.hbm [shape: f32[3,32,32], index: 2, kind: input, shape index: {}]   ;;  %s1140_s3 = inlined_call_operand.hbm [shape: f32[3,32,32], index: 3, kind: input, shape index: {}]   ;;  %s1141_s4 = inlined_call_operand.hbm [shape: f32[2,1,32], index: 4, kind: input, shape index: {}]   ;;  %s1142_s5 = inlined_call_operand.hbm [shape: f32[2,1,32], index: 5, kind: input, shape index: {}]   ;;  %s1143_s6 = inlined_call_operand.hbm [shape: f32[8,32], index: 6, kind: output, shape index: {}]  }
   0x1   :  { %12 = vsyncpa [#allocation6], 0 }
   0x2   :  { %13 = vsyncpa [#allocation9], 0 }
   0x3   :  { %14 = vsyncpa [#allocation12], 0 }
   0x4   :  { %15 = vsyncpa [#allocation4], 0  ;;  %s961_s21 = smov [#allocation5]   ;;  %s797_s25 = scalar_lea.hbm %s1138_s1, 128 }
   0x5   :  { %s32_s22 = sshll.u32 %s961_s21, 4  ;;  %p798_p0 = scmp.ne.s32.totalorder %s1138_s1, %s797_s25  ;;  %s33_s22 = int_to_ptr.vmem [resolvable:$true] %s32_s22 }
   0x6   :  { %p801_p1 = scmp.lt.u32.totalorder %s797_s25, %s1138_s1 }
   0x8   :  { %p803_p2 = pnand %p801_p1, %p798_p0 }
   0xa   :  { %806 = shalt.err (!%p803_p2)
}
   0xb   :  { %s807_s30 = scalar_lea.vmem %s33_s22, 128  ;;  %p812_p4 = scmp.lt.s32.totalorder %s33_s22, %s33_s22 }
   0xc   :  { %p808_p3 = scmp.ne.s32.totalorder %s33_s22, %s807_s30  ;;  %p813_p5 = scmp.lt.s32.totalorder %s807_s30, %s807_s30 }
   0xe   :  { %p814_p6 = por %p813_p5, %p812_p4 }
  0x10   :  { %p815_p7 = pnand %p814_p6, %p808_p3 }
  0x12   :  { %818 = shalt.err (!%p815_p7)
}
  0x13   :  { %35 = dma.hbm_to_vmem [thread:$0]  %s1138_s1, 128, %s33_s22, [#allocation6]  }
  0x14   :  { %s962_s9 = smov [#allocation8]   ;;  %s963_s11 = smov [#allocation2]  }
  0x15   :  { %s53_s10 = sshll.u32 %s962_s9, 4  ;;  %s22_s12 = sshll.u32 %s963_s11, 4  ;;  %s54_s10 = int_to_ptr.vmem [resolvable:$true] %s53_s10  ;;  %s23_s12 = int_to_ptr.vmem [resolvable:$true] %s22_s12 }
  0x16   :  { %s819_s15 = scalar_lea.hbm %s1140_s3, 1536 }
  0x17   :  { %p820_p8 = scmp.ne.s32.totalorder %s1140_s3, %s819_s15  ;;  %p823_p9 = scmp.lt.u32.totalorder %s819_s15, %s1140_s3 }
  0x19   :  { %p825_p10 = pnand %p823_p9, %p820_p8 }
  0x1b   :  { %828 = shalt.err (!%p825_p10)
}
  0x1c   :  { %s829_s1 = scalar_lea.vmem %s54_s10, 1536  ;;  %p834_p12 = scmp.lt.s32.totalorder %s54_s10, %s54_s10 }
  0x1d   :  { %p830_p11 = scmp.ne.s32.totalorder %s54_s10, %s829_s1  ;;  %p835_p13 = scmp.lt.s32.totalorder %s829_s1, %s829_s1 }
  0x1f   :  { %p836_p0 = por %p835_p13, %p834_p12 }
  0x21   :  { %p837_p1 = pnand %p836_p0, %p830_p11 }
  0x23   :  { %840 = shalt.err (!%p837_p1)
}
  0x24   :  { %s964_s20 = smov 128   ;;  %s965_s21 = smov 8  }
  0x25   :  { %59 = dma.hbm_to_vmem [thread:$0]  %s1140_s3, 1536, %s54_s10, [#allocation9], %s964_s20, %s964_s20, %s965_s21  }
  0x26   :  { %s841_s26 = scalar_lea.hbm %s1137_s0, 128 }
  0x27   :  { %p842_p2 = scmp.ne.s32.totalorder %s1137_s0, %s841_s26  ;;  %p845_p3 = scmp.lt.u32.totalorder %s841_s26, %s1137_s0 }
  0x29   :  { %p847_p4 = pnand %p845_p3, %p842_p2 }
  0x2b   :  { %850 = shalt.err (!%p847_p4)
}
  0x2c   :  { %s851_s7 = scalar_lea.vmem %s23_s12, 128  ;;  %p856_p6 = scmp.lt.s32.totalorder %s23_s12, %s23_s12 }
  0x2d   :  { %p852_p5 = scmp.ne.s32.totalorder %s23_s12, %s851_s7  ;;  %p857_p7 = scmp.lt.s32.totalorder %s851_s7, %s851_s7 }
  0x2f   :  { %p858_p8 = por %p857_p7, %p856_p6 }
  0x31   :  { %p859_p9 = pnand %p858_p8, %p852_p5 }
  0x33   :  { %862 = shalt.err (!%p859_p9)
}
  0x34   :  { %25 = dma.hbm_to_vmem [thread:$0]  %s1137_s0, 128, %s23_s12, [#allocation3]  }
  0x35   :  { %s966_s9 = smov [#allocation7]   ;;  %s967_s11 = smov [#allocation10]  }
  0x36   :  { %s41_s10 = sshll.u32 %s966_s9, 4  ;;  %s65_s13 = sshll.u32 %s967_s11, 4  ;;  %s42_s10 = int_to_ptr.vmem [resolvable:$true] %s41_s10  ;;  %s66_s13 = int_to_ptr.vmem [resolvable:$true] %s65_s13 }
  0x37   :  { %s863_s16 = scalar_lea.hbm %s1139_s2, 1536 }
  0x38   :  { %p864_p10 = scmp.ne.s32.totalorder %s1139_s2, %s863_s16  ;;  %p867_p11 = scmp.lt.u32.totalorder %s863_s16, %s1139_s2 }
  0x3a   :  { %p869_p12 = pnand %p867_p11, %p864_p10 }
  0x3c   :  { %872 = shalt.err (!%p869_p12)
}
  0x3d   :  { %s873_s0 = scalar_lea.vmem %s42_s10, 1536  ;;  %p878_p0 = scmp.lt.s32.totalorder %s42_s10, %s42_s10 }
  0x3e   :  { %p874_p13 = scmp.ne.s32.totalorder %s42_s10, %s873_s0  ;;  %p879_p1 = scmp.lt.s32.totalorder %s873_s0, %s873_s0 }
  0x40   :  { %p880_p2 = por %p879_p1, %p878_p0 }
  0x42   :  { %p881_p3 = pnand %p880_p2, %p874_p13 }
  0x44   :  { %884 = shalt.err (!%p881_p3)
}
  0x45   :  { %47 = dma.hbm_to_vmem [thread:$0]  %s1139_s2, 1536, %s42_s10, [#allocation6], %s964_s20, %s964_s20, %s965_s21  }
  0x46   :  { %s885_s25 = scalar_lea.hbm %s1141_s4, 32 }
  0x47   :  { %p886_p4 = scmp.ne.s32.totalorder %s1141_s4, %s885_s25  ;;  %p889_p5 = scmp.lt.u32.totalorder %s885_s25, %s1141_s4 }
  0x49   :  { %p891_p6 = pnand %p889_p5, %p886_p4 }
  0x4b   :  { %894 = shalt.err (!%p891_p6)
}
  0x4c   :  { %s895_s30 = scalar_lea.vmem %s66_s13, 32  ;;  %p900_p8 = scmp.lt.s32.totalorder %s66_s13, %s66_s13 }
  0x4d   :  { %p896_p7 = scmp.ne.s32.totalorder %s66_s13, %s895_s30  ;;  %p901_p9 = scmp.lt.s32.totalorder %s895_s30, %s895_s30 }
  0x4f   :  { %p902_p10 = por %p901_p9, %p900_p8 }
  0x51   :  { %p903_p11 = pnand %p902_p10, %p896_p7 }
  0x53   :  { %906 = shalt.err (!%p903_p11)
}
  0x54   :  { %s968_s2 = smov 16   ;;  %s969_s20 = smov 1  }
  0x55   :  { %71 = dma.hbm_to_vmem [thread:$0]  %s1141_s4, 32, %s66_s13, [#allocation9], %s968_s2, %s968_s2, %s969_s20  }
  0x56   :  { %s970_s3 = smov [#allocation11]   ;;  %s907_s11 = scalar_lea.hbm %s1142_s5, 32 }
  0x57   :  { %s77_s8 = sshll.u32 %s970_s3, 4  ;;  %p908_p12 = scmp.ne.s32.totalorder %s1142_s5, %s907_s11  ;;  %s78_s8 = int_to_ptr.vmem [resolvable:$true] %s77_s8 }
  0x58   :  { %p911_p13 = scmp.lt.u32.totalorder %s907_s11, %s1142_s5 }
  0x5a   :  { %p913_p0 = pnand %p911_p13, %p908_p12 }
  0x5c   :  { %916 = shalt.err (!%p913_p0)
}
  0x5d   :  { %s917_s18 = scalar_lea.vmem %s78_s8, 32  ;;  %p922_p2 = scmp.lt.s32.totalorder %s78_s8, %s78_s8 }
  0x5e   :  { %p918_p1 = scmp.ne.s32.totalorder %s78_s8, %s917_s18  ;;  %p923_p3 = scmp.lt.s32.totalorder %s917_s18, %s917_s18 }
  0x60   :  { %p924_p4 = por %p923_p3, %p922_p2 }
  0x62   :  { %p925_p5 = pnand %p924_p4, %p918_p1 }
  0x64   :  { %928 = shalt.err (!%p925_p5)
}
  0x65   :  { %83 = dma.hbm_to_vmem [thread:$0]  %s1142_s5, 32, %s78_s8, [#allocation12], %s968_s2, %s968_s2, %s969_s20  }
  0x66   :  { %951 = dma.done.wait [#allocation3], 128  }
  0x67   :  { %952 = vsyncadd [#allocation3], 4294967168 }
  0x68   :  { %953 = dma.done.wait [#allocation6], 1664  }
  0x69   :  { %954 = vsyncadd [#allocation6], 4294965632 }
  0x6a   :  { %955 = dma.done.wait [#allocation9], 1568  }
  0x6b   :  { %956 = vsyncadd [#allocation9], 4294965728 }
  0x6c   :  { %957 = dma.done.wait [#allocation12], 32  }
  0x6d   :  { %958 = vsyncadd [#allocation12], 4294967264  ;;  %v971_v0 = vmov 0.0|0.0   ;;  %vm972_vm0 = vmmov 0   ;;  %v973_v1 = vmov 0.0   ;;  %v108_v2 = vld [vmem:[#allocation8] sm:$0xff] }
  0x6e   :  { %737 = vmatprep.subr.bf16.mxu0 %v971_v0  ;;  %743 = vmatprep.subr.bf16.mxu1 %v971_v0  ;;  %v109_v3 = vld [vmem:[#allocation8 + $0x8] sm:$0xff]  ;;  %v104_v4 = vld [vmem:[#allocation7] sm:$0xff]  ;;  %v110_v7 = vld [vmem:[#allocation8 + $0x10] sm:$0xff]  ;;  %vm112_vm1 = vcmask 261120   ;;  %s974_s5 = smov [#allocation13]  }
  0x6f   :  { %679 = vmatprep.mubr.msk.f32.mxu0 %vm972_vm0, %v973_v1  ;;  %690 = vmatprep.mubr.msk.f32.mxu1 %vm972_vm0, %v973_v1  ;;  %v738_v5 = vpack.c.bf16 %v109_v3, %v108_v2  ;;  %v105_v6 = vld [vmem:[#allocation7 + $0x8] sm:$0xff]  ;;  %v111_v8 = vld [vmem:[#allocation8 + $0x18] sm:$0xff]  ;;  %v106_v10 = vld [vmem:[#allocation7 + $0x10] sm:$0xff]  ;;  %s617_s19 = sshll.u32 %s974_s5, 4  ;;  %s618_s19 = int_to_ptr.vmem [resolvable:$true] %s617_s19 }
  0x70   :  { %v744_v9 = vpack.c.bf16 %v105_v6, %v104_v4  ;;  %v107_v11 = vld [vmem:[#allocation7 + $0x18] sm:$0xff]  ;;  %v741_v12 = vpack.c.bf16 %v111_v8, %v110_v7  ;;  %v279_v14 = vld [vmem:[#allocation8 + $0x20] sm:$0xff]  ;;  %v280_v15 = vld [vmem:[#allocation8 + $0x28] sm:$0xff]  ;;  %s929_s1 = scalar_lea.vmem %s618_s19, 128  ;;  %p934_p7 = scmp.lt.s32.totalorder %s618_s19, %s618_s19 }
  0x71   :  { %739 = vmatpush3.bf16.msra.mxu0 %v738_v5  ;;  %v747_v13 = vpack.c.bf16 %v107_v11, %v106_v10  ;;  %v274_v16 = vld [vmem:[#allocation7 + $0x20] sm:$0xff]  ;;  %v275_v17 = vld [vmem:[#allocation7 + $0x28] sm:$0xff]  ;;  %v1096_v18 = vld [vmem:[#allocation5] sm:$0xff]  ;;  %v750_v19 = vpack.c.bf16 %v280_v15, %v279_v14  ;;  %p930_p6 = scmp.ne.s32.totalorder %s618_s19, %s929_s1  ;;  %p935_p8 = scmp.lt.s32.totalorder %s929_s1, %s929_s1 }
  0x72   :  { %745 = vmatpush3.bf16.msra.mxu1 %v744_v9  ;;  %740 = vmatprep.subr.bf16.mxu0 %v971_v0  ;;  %v103_v20 = vld [vmem:[#allocation2] sm:$0xff]  ;;  %v756_v21 = vpack.c.bf16 %v275_v17, %v274_v16  ;;  %v282_v23 = vld [vmem:[#allocation8 + $0x38] sm:$0xff]  ;;  %v439_v28 = vld [vmem:[#allocation7 + $0x40] sm:$0xff] }
  0x73   :  { %746 = vmatprep.subr.bf16.mxu1 %v971_v0  ;;  %v281_v22 = vld [vmem:[#allocation8 + $0x30] sm:$0xff]  ;;  %v277_v25 = vld [vmem:[#allocation7 + $0x38] sm:$0xff]  ;;  %v440_v29 = vld [vmem:[#allocation7 + $0x48] sm:$0xff]  ;;  %p936_p9 = por %p935_p8, %p934_p7 }
  0x74   :  { %v276_v24 = vld [vmem:[#allocation7 + $0x30] sm:$0xff]  ;;  %v753_v26 = vpack.c.bf16 %v282_v23, %v281_v22  ;;  %v521_v30 = vld [vmem:[#allocation8 + $0x40] sm:$0xff]  ;;  %v522_v31 = vld [vmem:[#allocation8 + $0x48] sm:$0xff]  ;;  %v762_v32 = vpack.c.bf16 %v440_v29, %v439_v28 }
  0x75   :  { %742 = vmatpush3.bf16.msra.mxu0 %v741_v12  ;;  %v759_v27 = vpack.c.bf16 %v277_v25, %v276_v24  ;;  %v768_v33 = vpack.c.bf16 %v522_v31, %v521_v30  ;;  %v441_v34 = vld [vmem:[#allocation7 + $0x50] sm:$0xff]  ;;  %v442_v35 = vld [vmem:[#allocation7 + $0x58] sm:$0xff]  ;;  %v631_v42 = vld [vmem:[#allocation10] ss:$0 sm:$0xff]  ;;  %p937_p10 = pnand %p936_p9, %p930_p6 }
  0x76   :  { %748 = vmatpush3.bf16.msra.mxu1 %v747_v13  ;;  %749 = vmatprep.subr.bf16.mxu0 %v971_v0  ;;  %v523_v36 = vld [vmem:[#allocation8 + $0x50] sm:$0xff]  ;;  %v524_v37 = vld [vmem:[#allocation8 + $0x58] sm:$0xff]  ;;  %v765_v38 = vpack.c.bf16 %v442_v35, %v441_v34  ;;  %v635_v50 = vld [vmem:[#allocation10 + $0x1] ss:$0 sm:$0xff] }
  0x77   :  { %755 = vmatprep.subr.bf16.mxu1 %v971_v0  ;;  %v771_v39 = vpack.c.bf16 %v524_v37, %v523_v36  ;;  %v639_v62 = vld [vmem:[#allocation11 + $0x1] ss:$0 sm:$0xff] }
  0x78   :  { %680 = vmatmul.mubr.msk.f32.vlgmr.msra.gmra.mrb[0].mxu0 %vm112_vm1, %v1096_v18 }
  0x79   :  { %691 = vmatmul.mubr.msk.f32.vlgmr.msra.gmra.mrb[0].mxu1 %vm112_vm1, %v103_v20  ;;  %751 = vmatpush3.bf16.msra.mxu0 %v750_v19 }
  0x7a   :  { %757 = vmatpush3.bf16.msra.mxu1 %v756_v21  ;;  %752 = vmatprep.subr.bf16.mxu0 %v971_v0 }
  0x7b   :  { %758 = vmatprep.subr.bf16.mxu1 %v971_v0  ;;  %701 = vmatprep.mubr.msk.f32.mxu0 %vm972_vm0, %v973_v1 }
  0x7c   :  { %712 = vmatprep.mubr.msk.f32.mxu1 %vm972_vm0, %v973_v1 }
  0x7d   :  { %754 = vmatpush3.bf16.msra.mxu0 %v753_v26 }
  0x7e   :  { %760 = vmatpush3.bf16.msra.mxu1 %v759_v27  ;;  %761 = vmatprep.subr.bf16.mxu0 %v971_v0 }
  0x7f   :  { %767 = vmatprep.subr.bf16.mxu1 %v971_v0 }
  0x80   :  { %702 = vmatmul.mubr.msk.f32.vlgmr.msra.gmra.mrb[2].mxu0 %vm112_vm1, %v1096_v18 }
  0x81   :  { %713 = vmatmul.mubr.msk.f32.vlgmr.msra.gmra.mrb[2].mxu1 %vm112_vm1, %v103_v20  ;;  %763 = vmatpush3.bf16.msra.mxu0 %v762_v32 }
  0x82   :  { %769 = vmatpush3.bf16.msra.mxu1 %v768_v33  ;;  %764 = vmatprep.subr.bf16.mxu0 %v971_v0 }
  0x83   :  { %770 = vmatprep.subr.bf16.mxu1 %v971_v0  ;;  %734 = vmatprep.mubr.msk.f32.mxu1 %vm972_vm0, %v973_v1 }
  0x84   :  { %723 = vmatprep.mubr.msk.f32.mxu0 %vm972_vm0, %v973_v1  ;;  %v637_v1 = vld [vmem:[#allocation11] ss:$0 sm:$0xff] }
  0x85   :  { %766 = vmatpush3.bf16.msra.mxu0 %v765_v38 }
  0x86   :  { %772 = vmatpush3.bf16.msra.mxu1 %v771_v39 }
  0x88   :  { %724 = vmatmul.mubr.msk.f32.vlgmr.msra.gmra.mrb[4].mxu0 %vm112_vm1, %v103_v20 }
  0x89   :  { %735 = vmatmul.mubr.msk.f32.vlgmr.msra.gmra.mrb[4].mxu1 %vm112_vm1, %v1096_v18 }
 0x14b   :  { %v182_v40 = vpop.f32.mrb[0].mxu0 }
 0x14c   :  { %v255_v41 = vpop.f32.mrb[0].mxu1  ;;  %v681_v43 = vpop.f32.mrb[1].mxu0 }
 0x14d   :  { %v256_v44 = vadd.f32 %v255_v41, %v182_v40  ;;  %v692_v45 = vpop.f32.mrb[1].mxu1 }
 0x14f   :  { %v266_v46 = vadd.f32 %v631_v42, %v256_v44 }
 0x151   :  { %v632_v47 = vmul.f32 -1.442695, %v266_v46 }
 0x153   :  { %787 = vpow2.f32 %v632_v47  ;;  %v349_v48 = vpop.f32.mrb[2].mxu0 }
 0x154   :  { %v419_v49 = vpop.f32.mrb[2].mxu1  ;;  %v703_v51 = vpop.f32.mrb[3].mxu0 }
 0x155   :  { %v420_v52 = vadd.f32 %v419_v49, %v349_v48  ;;  %v714_v53 = vpop.f32.mrb[3].mxu1 }
 0x157   :  { %v431_v54 = vadd.f32 %v635_v50, %v420_v52 }
 0x159   :  { %v636_v55 = vmul.f32 -1.442695, %v431_v54 }
 0x15b   :  { %789 = vpow2.f32 %v636_v55  ;;  %v516_v56 = vpop.f32.mrb[4].mxu0 }
 0x15c   :  { %v599_v57 = vpop.f32.mrb[4].mxu1  ;;  %v725_v58 = vpop.f32.mrb[5].mxu0  ;;  %v517_v3 = vadd.f32 %v637_v1, %v516_v56 }
 0x15d   :  { %v788_v59 = vpop.eup %787  ;;  %v736_v60 = vpop.f32.mrb[5].mxu1  ;;  %v600_v2 = vadd.f32 %v639_v62, %v599_v57 }
 0x15e   :  { %v270_v61 = vadd.f32 1.0, %v788_v59 }
 0x160   :  { %791 = vrcp.f32 %v270_v61 }
 0x165   :  { %v790_v63 = vpop.eup %789 }
 0x166   :  { %v435_v0 = vadd.f32 1.0, %v790_v63 }
 0x168   :  { %793 = vrcp.f32 %v435_v0 }
 0x16a   :  { %v792_v4 = vpop.eup %791 }
 0x16b   :  { %v603_v5 = vmul.f32 %v792_v4, %v600_v2 }
 0x16d   :  { %v604_v6 = vadd.f32 %v603_v5, %v517_v3 }
 0x16f   :  { %795 = vtanh.f32 %v604_v6 }
 0x172   :  { %v794_v7 = vpop.eup %793 }
 0x173   :  { %v606_v8 = vsub.f32 1.0, %v794_v7  ;;  %v608_v11 = vmul.f32 %v794_v7, %v1096_v18 }
 0x179   :  { %v796_v9 = vpop.eup %795 }
 0x17a   :  { %v607_v10 = vmul.f32 %v796_v9, %v606_v8 }
 0x17c   :  { %v609_v12 = vadd.f32 %v608_v11, %v607_v10 }
 0x17e   :  { %610 = vst.msk [vmem:[#allocation13] sm:$0xff] %vm112_vm1, %v609_v12 }
 0x17f   :  { %940 = shalt.err (!%p937_p10)
}
 0x180   :  { %s941_s22 = scalar_lea.hbm %s1143_s6, 128 }
 0x181   :  { %p942_p11 = scmp.ne.s32.totalorder %s1143_s6, %s941_s22  ;;  %p945_p12 = scmp.lt.u32.totalorder %s941_s22, %s1143_s6 }
 0x183   :  { %p947_p13 = pnand %p945_p12, %p942_p11 }
 0x185   :  { %950 = shalt.err (!%p947_p13)
}
 0x186   :  { %620 = dma.vmem_to_hbm [thread:$0]  %s618_s19, 128, %s1143_s6, [#allocation4]  }
 0x187   :  { %959 = dma.done.wait [#allocation4], 128  }
 0x188   :  { %960 = vsyncadd [#allocation4], 4294967168 }
 0x189   :  { %624 = vsyncpa [#allocation3], 1 }
 0x18a   :  { %625 = vsyncpa [#allocation6], 1 }
 0x18b   :  { %626 = vsyncpa [#allocation9], 1 }
 0x18c   :  { %627 = vsyncpa [#allocation12], 1 }
 0x18d   :  { %628 = vsyncpa [#allocation4], 1 }

</bundles_post_ra>
